<compile_context>
chip_gen: v5e
topology: v5e:2x2
jax: 0.10.0
libtpu: 0.0.40
codegen_flags: <defaults>
</compile_context>

<pallas_src>
import functools

import jax
import jax.numpy as jnp
from jax import lax
from jax.experimental import pallas as pl
from jax.experimental.pallas import tpu as pltpu


def _batch_contrast_kernel(q_ref, a_ref, o_ref,
                           qn_sc, m_sc, l_sc, diag_sc, *,
                           inv_gama: float, use_bf16: bool):
    eps = 1e-8
    i = pl.program_id(0)
    k = pl.program_id(1)

    @pl.when(k == 0)
    def _init():
        # Normalize the q row tile once per row tile (the q block index is
        # constant along the streamed ans axis), fold in 1/gama, and cache it.
        q = q_ref[...]                                               # [T, Dp]
        q_inv = lax.rsqrt(
            jnp.maximum(jnp.sum(q * q, axis=1, keepdims=True), eps * eps))
        qn_sc[...] = q * (q_inv * jnp.float32(inv_gama))
        m_sc[...] = jnp.full(m_sc.shape, -jnp.inf, dtype=m_sc.dtype)
        l_sc[...] = jnp.zeros(l_sc.shape, dtype=l_sc.dtype)

    a = a_ref[...]                                                   # [T, Dp]
    a_inv = lax.rsqrt(
        jnp.maximum(jnp.sum(a * a, axis=1, keepdims=True), eps * eps))
    an = a * a_inv

    qn = qn_sc[...]
    lhs = qn.astype(jnp.bfloat16) if use_bf16 else qn
    rhs = an.astype(jnp.bfloat16) if use_bf16 else an

    # sim[r, c] = cos(q_r, a_c) / gama ; contraction over D on both operands
    # (no explicit transpose -> MXU fed directly, f32 accumulate).
    sim = lax.dot_general(lhs, rhs, (((1,), (1,)), ((), ())),
                          preferred_element_type=jnp.float32)        # [T, T]

    # Capture the numerator sim_ii from the diagonal tile (T == T on both axes,
    # so the diagonal lives exactly in the k == i tile).  No BxB mask needed.
    @pl.when(k == i)
    def _capture_diag():
        r = lax.broadcasted_iota(jnp.int32, sim.shape, 0)
        c = lax.broadcasted_iota(jnp.int32, sim.shape, 1)
        diag_sc[...] = jnp.sum(jnp.where(r == c, sim, 0.0),
                               axis=1, keepdims=True)

    # Streaming log-sum-exp over the denominator (column) axis.
    m_prev = m_sc[...]
    m_new = jnp.maximum(m_prev, jnp.max(sim, axis=1, keepdims=True))
    l_sc[...] = (jnp.exp(m_prev - m_new) * l_sc[...]
                 + jnp.sum(jnp.exp(sim - m_new), axis=1, keepdims=True))
    m_sc[...] = m_new

    @pl.when(k == pl.num_programs(1) - 1)
    def _finalize():
        # per-row loss = logsumexp_j(sim_ij) - sim_ii
        o_ref[...] = jnp.log(l_sc[...]) + m_sc[...] - diag_sc[...]


def _pick_tile(n: int, max_tile: int) -> int:
    # Largest divisor of n among MXU/sublane-friendly sizes (<= max_tile);
    # fall back to the full extent (legal via the full-array-dim exception).
    for t in (256, 128, 64, 32, 16, 8):
        if t <= max_tile and n % t == 0:
            return t
    return n


def batch_contrast_loss(que_batch, ans_batch, gama: float, *,
                        use_bf16_matmul: bool = False,
                        max_tile: int = 256):
    """Pallas TPU implementation of BatchContrastLoss.forward.

    Args:
      que_batch: [B, D] float array.
      ans_batch: [B, D] float array.
      gama: temperature (python float).
      use_bf16_matmul: feed the MXU bf16 operands (f32 accumulate) — ~2x MXU
        throughput at rtol ~1e-3 accuracy.
      max_tile: cap on the square batch tile size (tuning / testing knob).
    Returns:
      [1] float32 loss (same shape as the torch module's output).
    """
    assert que_batch.shape == ans_batch.shape and que_batch.ndim == 2
    b, d = que_batch.shape

    # Pad the feature dim to a multiple of 128 lanes; zero columns are inert
    # for both the norms and the dot products.
    dp = ((d + 127) // 128) * 128
    q = que_batch.astype(jnp.float32)
    a = ans_batch.astype(jnp.float32)
    if dp != d:
        q = jnp.pad(q, ((0, 0), (0, dp - d)))
        a = jnp.pad(a, ((0, 0), (0, dp - d)))

    # One tile size on both batch axes so the diagonal tile is exactly k == i.
    t = _pick_tile(b, max_tile)
    grid = (b // t, b // t)

    # VMEM budget: double-buffered q/a tiles + cached-qn scratch + sim block +
    # tiny per-row scratch; x2 safety margin, clamped to [32 MiB, 64 MiB].
    est = 4 * (2 * t * dp + 2 * t * dp + t * dp + t * t + 8 * t)
    vmem_limit = int(min(max(2 * est, 32 * 1024 * 1024), 64 * 1024 * 1024))

    kernel = functools.partial(_batch_contrast_kernel,
                               inv_gama=1.0 / float(gama),
                               use_bf16=use_bf16_matmul)

    per_row = pl.pallas_call(
        kernel,
        out_shape=jax.ShapeDtypeStruct((b, 1), jnp.float32),
        grid_spec=pltpu.PrefetchScalarGridSpec(
            num_scalar_prefetch=0,
            grid=grid,
            in_specs=[
                pl.BlockSpec((t, dp), lambda i, k: (i, 0)),   # q row tile
                pl.BlockSpec((t, dp), lambda i, k: (k, 0)),   # ans column tile
            ],
            out_specs=pl.BlockSpec((t, 1), lambda i, k: (i, 0)),
            scratch_shapes=[pltpu.VMEM((t, dp), jnp.float32),   # cached qn/gama
                            pltpu.VMEM((t, 1), jnp.float32),    # running max
                            pltpu.VMEM((t, 1), jnp.float32),    # running sum
                            pltpu.VMEM((t, 1), jnp.float32)],   # diag sim_ii
        ),
        compiler_params=pltpu.CompilerParams(
            dimension_semantics=("parallel", "arbitrary"),
            vmem_limit_bytes=vmem_limit),
    )(q, a)

    return (jnp.sum(per_row) / jnp.float32(b)).reshape((1,))


def _reference_jax(que_batch, ans_batch, gama):
    # Plain-JAX replica of the PyTorch double loop, for a sanity check.
    eps = 1e-8
    qn = que_batch / jnp.maximum(
        jnp.linalg.norm(que_batch, axis=1, keepdims=True), eps)
    an = ans_batch / jnp.maximum(
        jnp.linalg.norm(ans_batch, axis=1, keepdims=True), eps)
    sim = qn @ an.T / gama
    e = jnp.exp(sim)
    loss = -jnp.log(jnp.diag(e) / jnp.sum(e, axis=1))
    return jnp.mean(loss).reshape((1,))


if __name__ == "__main__":
    key = jax.random.PRNGKey(0)
    k1, k2, k3, k4 = jax.random.split(key, 4)
    gama = 0.5

    # Small shapes consistent with the module: batch=8, hidden=32.
    B, D = 8, 32
    que = jax.random.normal(k1, (B, D), dtype=jnp.float32)
    ans = jax.random.normal(k2, (B, D), dtype=jnp.float32)
    ref = _reference_jax(que, ans, gama)

    # f32 MXU path: matches the reference tightly.
    loss = batch_contrast_loss(que, ans, gama)
    jax.block_until_ready(loss)
    assert jnp.allclose(loss, ref, rtol=1e-5, atol=1e-5), (loss, ref)

    # bf16 MXU path: looser tolerance (operands in bf16, f32 accumulate).
    loss_bf16 = batch_contrast_loss(que, ans, gama, use_bf16_matmul=True)
    jax.block_until_ready(loss_bf16)
    assert jnp.allclose(loss_bf16, ref, rtol=1e-1, atol=1e-1), (loss_bf16, ref)

    # Multi-tile path (grid 4x4): exercises the streaming logsumexp, the
    # diagonal capture at k == i, and the pl.when init/finalize gating.
    B2, D2 = 32, 48
    que2 = jax.random.normal(k3, (B2, D2), dtype=jnp.float32)
    ans2 = jax.random.normal(k4, (B2, D2), dtype=jnp.float32)
    ref2 = _reference_jax(que2, ans2, gama)
    loss2 = batch_contrast_loss(que2, ans2, gama, max_tile=8)
    jax.block_until_ready(loss2)
    assert jnp.allclose(loss2, ref2, rtol=1e-5, atol=1e-5), (loss2, ref2)

    print("KERNEL_OK")
</pallas_src>

<mosaic_0001>
module attributes {stable_mosaic.version = 11 : i64} {
  func.func @_batch_contrast_kernel(%arg0: i32, %arg1: i32, %arg2: memref<8x128xf32, #tpu.memory_space<vmem>>, %arg3: memref<8x128xf32, #tpu.memory_space<vmem>>, %arg4: memref<8x1xf32, #tpu.memory_space<vmem>>, %arg5: memref<8x128xf32, #tpu.memory_space<vmem>>, %arg6: memref<8x1xf32, #tpu.memory_space<vmem>>, %arg7: memref<8x1xf32, #tpu.memory_space<vmem>>, %arg8: memref<8x1xf32, #tpu.memory_space<vmem>>) attributes {dimension_semantics = [#tpu.dimension_semantics<parallel>, #tpu.dimension_semantics<arbitrary>], iteration_bounds = array<i64: 1, 1>, scalar_prefetch = 0 : i64, scratch_operands = 4 : i64, tpu.core_type = #tpu.core_type<tc>, window_params = [{transform_indices = @transform_0, window_bounds = array<i64: 8, 128>}, {transform_indices = @transform_1, window_bounds = array<i64: 8, 128>}, {transform_indices = @transform_2, window_bounds = array<i64: 8, 1>}]} {
    %c0_i32 = arith.constant 0 : i32
    %0 = arith.cmpi eq, %arg1, %c0_i32 : i32
    %1 = arith.extui %0 : i1 to i32
    %c0_i32_0 = arith.constant 0 : i32
    %2 = arith.cmpi ne, %1, %c0_i32_0 : i32
    scf.if %2 {
      %c0_19 = arith.constant 0 : index
      %c0_20 = arith.constant 0 : index
      %36 = vector.load %arg2[%c0_19, %c0_20] : memref<8x128xf32, #tpu.memory_space<vmem>>, vector<8x128xf32>
      %37 = arith.mulf %36, %36 : vector<8x128xf32>
      %cst_21 = arith.constant dense<0.000000e+00> : vector<8xf32>
      %38 = vector.multi_reduction <add>, %37, %cst_21 [1] : vector<8x128xf32> to vector<8xf32>
      %39 = vector.shape_cast %38 : vector<8xf32> to vector<8x1xf32>
      %cst_22 = arith.constant 1.000000e-16 : f32
      %40 = vector.broadcast %cst_22 : f32 to vector<8x1xf32>
      %41 = arith.maximumf %39, %40 : vector<8x1xf32>
      %42 = math.rsqrt %41 : vector<8x1xf32>
      %cst_23 = arith.constant 2.000000e+00 : f32
      %43 = vector.broadcast %cst_23 : f32 to vector<8x1xf32>
      %44 = arith.mulf %42, %43 : vector<8x1xf32>
      %45 = vector.broadcast %44 : vector<8x1xf32> to vector<8x128xf32>
      %46 = arith.mulf %36, %45 : vector<8x128xf32>
      %c0_24 = arith.constant 0 : index
      %c0_25 = arith.constant 0 : index
      %47 = vector.load %arg5[%c0_24, %c0_25] : memref<8x128xf32, #tpu.memory_space<vmem>>, vector<8x128xf32>
      tpu.vector_store %arg5[%c0_24, %c0_25], %46 {strides = array<i32>} : memref<8x128xf32, #tpu.memory_space<vmem>>, vector<8x128xf32>,
      %cst_26 = arith.constant 0xFF800000 : f32
      %48 = vector.broadcast %cst_26 : f32 to vector<8x1xf32>
      %c0_27 = arith.constant 0 : index
      %c0_28 = arith.constant 0 : index
      %49 = vector.load %arg6[%c0_27, %c0_28] : memref<8x1xf32, #tpu.memory_space<vmem>>, vector<8x1xf32>
      tpu.vector_store %arg6[%c0_27, %c0_28], %48 {strides = array<i32>} : memref<8x1xf32, #tpu.memory_space<vmem>>, vector<8x1xf32>,
      %cst_29 = arith.constant 0.000000e+00 : f32
      %50 = vector.broadcast %cst_29 : f32 to vector<8x1xf32>
      %c0_30 = arith.constant 0 : index
      %c0_31 = arith.constant 0 : index
      %51 = vector.load %arg7[%c0_30, %c0_31] : memref<8x1xf32, #tpu.memory_space<vmem>>, vector<8x1xf32>
      tpu.vector_store %arg7[%c0_30, %c0_31], %50 {strides = array<i32>} : memref<8x1xf32, #tpu.memory_space<vmem>>, vector<8x1xf32>,
    } else {
    }
    %c0 = arith.constant 0 : index
    %c0_1 = arith.constant 0 : index
    %3 = vector.load %arg3[%c0, %c0_1] : memref<8x128xf32, #tpu.memory_space<vmem>>, vector<8x128xf32>
    %4 = arith.mulf %3, %3 : vector<8x128xf32>
    %cst = arith.constant dense<0.000000e+00> : vector<8xf32>
    %5 = vector.multi_reduction <add>, %4, %cst [1] : vector<8x128xf32> to vector<8xf32>
    %6 = vector.shape_cast %5 : vector<8xf32> to vector<8x1xf32>
    %cst_2 = arith.constant 1.000000e-16 : f32
    %7 = vector.broadcast %cst_2 : f32 to vector<8x1xf32>
    %8 = arith.maximumf %6, %7 : vector<8x1xf32>
    %9 = math.rsqrt %8 : vector<8x1xf32>
    %10 = vector.broadcast %9 : vector<8x1xf32> to vector<8x128xf32>
    %11 = arith.mulf %3, %10 : vector<8x128xf32>
    %c0_3 = arith.constant 0 : index
    %c0_4 = arith.constant 0 : index
    %12 = vector.load %arg5[%c0_3, %c0_4] : memref<8x128xf32, #tpu.memory_space<vmem>>, vector<8x128xf32>
    %cst_5 = arith.constant dense<0.000000e+00> : vector<8x8xf32>
    %13 = tpu.matmul %12, %11, %cst_5 {dimension_numbers = #tpu.dot_dimension_numbers<[1], [1], [0], [0], [0, 0, 1, 0], [], []>} : vector<8x128xf32>, vector<8x128xf32>, vector<8x8xf32> -> vector<8x8xf32>
    %14 = arith.cmpi eq, %arg1, %arg0 : i32
    %15 = arith.extui %14 : i1 to i32
    %c0_i32_6 = arith.constant 0 : i32
    %16 = arith.cmpi ne, %15, %c0_i32_6 : i32
    scf.if %16 {
      %36 = tpu.iota {dimensions = array<i32: 0>} : vector<8x8xi32>
      %37 = tpu.iota {dimensions = array<i32: 1>} : vector<8x8xi32>
      %38 = arith.cmpi eq, %36, %37 : vector<8x8xi32>
      %cst_19 = arith.constant 0.000000e+00 : f32
      %39 = vector.broadcast %cst_19 : f32 to vector<8x8xf32>
      %40 = arith.select %38, %13, %39 : vector<8x8xi1>, vector<8x8xf32>
      %cst_20 = arith.constant dense<0.000000e+00> : vector<8xf32>
      %41 = vector.multi_reduction <add>, %40, %cst_20 [1] : vector<8x8xf32> to vector<8xf32>
      %42 = vector.shape_cast %41 : vector<8xf32> to vector<8x1xf32>
      %c0_21 = arith.constant 0 : index
      %c0_22 = arith.constant 0 : index
      %43 = vector.load %arg8[%c0_21, %c0_22] : memref<8x1xf32, #tpu.memory_space<vmem>>, vector<8x1xf32>
      tpu.vector_store %arg8[%c0_21, %c0_22], %42 {strides = array<i32>} : memref<8x1xf32, #tpu.memory_space<vmem>>, vector<8x1xf32>,
    } else {
    }
    %c0_7 = arith.constant 0 : index
    %c0_8 = arith.constant 0 : index
    %17 = vector.load %arg6[%c0_7, %c0_8] : memref<8x1xf32, #tpu.memory_space<vmem>>, vector<8x1xf32>
    %cst_9 = arith.constant dense<0xFF800000> : vector<8xf32>
    %18 = vector.multi_reduction <maximumf>, %13, %cst_9 [1] : vector<8x8xf32> to vector<8xf32>
    %19 = vector.shape_cast %18 : vector<8xf32> to vector<8x1xf32>
    %20 = arith.maximumf %17, %19 : vector<8x1xf32>
    %21 = arith.subf %17, %20 : vector<8x1xf32>
    %22 = math.exp %21 : vector<8x1xf32>
    %c0_10 = arith.constant 0 : index
    %c0_11 = arith.constant 0 : index
    %23 = vector.load %arg7[%c0_10, %c0_11] : memref<8x1xf32, #tpu.memory_space<vmem>>, vector<8x1xf32>
    %24 = arith.mulf %22, %23 : vector<8x1xf32>
    %25 = vector.broadcast %20 : vector<8x1xf32> to vector<8x8xf32>
    %26 = arith.subf %13, %25 : vector<8x8xf32>
    %27 = math.exp %26 : vector<8x8xf32>
    %cst_12 = arith.constant dense<0.000000e+00> : vector<8xf32>
    %28 = vector.multi_reduction <add>, %27, %cst_12 [1] : vector<8x8xf32> to vector<8xf32>
    %29 = vector.shape_cast %28 : vector<8xf32> to vector<8x1xf32>
    %30 = arith.addf %24, %29 : vector<8x1xf32>
    %c0_13 = arith.constant 0 : index
    %c0_14 = arith.constant 0 : index
    %31 = vector.load %arg7[%c0_13, %c0_14] : memref<8x1xf32, #tpu.memory_space<vmem>>, vector<8x1xf32>
    tpu.vector_store %arg7[%c0_13, %c0_14], %30 {strides = array<i32>} : memref<8x1xf32, #tpu.memory_space<vmem>>, vector<8x1xf32>,
    %c0_15 = arith.constant 0 : index
    %c0_16 = arith.constant 0 : index
    %32 = vector.load %arg6[%c0_15, %c0_16] : memref<8x1xf32, #tpu.memory_space<vmem>>, vector<8x1xf32>
    tpu.vector_store %arg6[%c0_15, %c0_16], %20 {strides = array<i32>} : memref<8x1xf32, #tpu.memory_space<vmem>>, vector<8x1xf32>,
    %c0_i32_17 = arith.constant 0 : i32
    %33 = arith.cmpi eq, %arg1, %c0_i32_17 : i32
    %34 = arith.extui %33 : i1 to i32
    %c0_i32_18 = arith.constant 0 : i32
    %35 = arith.cmpi ne, %34, %c0_i32_18 : i32
    scf.if %35 {
      %c0_19 = arith.constant 0 : index
      %c0_20 = arith.constant 0 : index
      %36 = vector.load %arg7[%c0_19, %c0_20] : memref<8x1xf32, #tpu.memory_space<vmem>>, vector<8x1xf32>
      %37 = math.log %36 : vector<8x1xf32>
      %c0_21 = arith.constant 0 : index
      %c0_22 = arith.constant 0 : index
      %38 = vector.load %arg6[%c0_21, %c0_22] : memref<8x1xf32, #tpu.memory_space<vmem>>, vector<8x1xf32>
      %39 = arith.addf %37, %38 : vector<8x1xf32>
      %c0_23 = arith.constant 0 : index
      %c0_24 = arith.constant 0 : index
      %40 = vector.load %arg8[%c0_23, %c0_24] : memref<8x1xf32, #tpu.memory_space<vmem>>, vector<8x1xf32>
      %41 = arith.subf %39, %40 : vector<8x1xf32>
      %c0_25 = arith.constant 0 : index
      %c0_26 = arith.constant 0 : index
      %42 = vector.load %arg4[%c0_25, %c0_26] : memref<8x1xf32, #tpu.memory_space<vmem>>, vector<8x1xf32>
      tpu.vector_store %arg4[%c0_25, %c0_26], %41 {strides = array<i32>} : memref<8x1xf32, #tpu.memory_space<vmem>>, vector<8x1xf32>,
    } else {
    }
    return
  }
  func.func @transform_0(%arg0: i32, %arg1: i32) -> (i32, i32) {
    %c0_i32 = arith.constant 0 : i32
    %c0_i32_0 = arith.constant 0 : i32
    return %arg0, %c0_i32 : i32, i32
  }
  func.func @transform_1(%arg0: i32, %arg1: i32) -> (i32, i32) {
    %c0_i32 = arith.constant 0 : i32
    %c0_i32_0 = arith.constant 0 : i32
    return %arg1, %c0_i32 : i32, i32
  }
  func.func @transform_2(%arg0: i32, %arg1: i32) -> (i32, i32) {
    %c0_i32 = arith.constant 0 : i32
    %c0_i32_0 = arith.constant 0 : i32
    return %arg0, %c0_i32 : i32, i32
  }
}

</mosaic_0001>

<bundles_post_ra>
// kernel: tpu_custom_call.1
= control target key start
LH: loop header
LB: loop body
LE: loop exit
PB: predicated region body
PF: predicated region fallthrough
CT: control target
= control target key end

     0   :  { %7 = vsyncpa [#allocation7], 0  ;;  %s267_s0 = inlined_call_operand.hbm [shape: f32[8,128], index: 0, kind: input, shape index: {}]   ;;  %s268_s1 = inlined_call_operand.hbm [shape: f32[8,128], index: 1, kind: input, shape index: {}]   ;;  %s269_s2 = inlined_call_operand.vmem [shape: f32[8,1], index: 2, kind: output, shape index: {}]  }
   0x1   :  { %s14_s11 = sshll.u32 %s267_s0, 4  ;;  %s15_s11 = int_to_ptr.hbm [resolvable:$true] %s14_s11 }
   0x2   :  { %8 = vsyncpa [#allocation9], 0  ;;  %s229_s12 = smov [#allocation6]   ;;  %s25_s16 = sshll.u32 %s268_s1, 4  ;;  %s26_s16 = int_to_ptr.hbm [resolvable:$true] %s25_s16 }
   0x3   :  { %s16_s13 = sshll.u32 %s229_s12, 4  ;;  %s230_s17 = smov [#allocation8]   ;;  %s17_s13 = int_to_ptr.vmem [resolvable:$true] %s16_s13 }
   0x4   :  { %19 = dma.hbm_to_vmem [thread:$0]  %s15_s11, 128, %s17_s13, [#allocation7]  }
   0x5   :  { %s27_s18 = sshll.u32 %s230_s17, 4  ;;  %s28_s18 = int_to_ptr.vmem [resolvable:$true] %s27_s18 }
   0x6   :  { %30 = dma.hbm_to_vmem [thread:$0]  %s26_s16, 128, %s28_s18, [#allocation9]  }
   0x7   :  { %225 = dma.done.wait [#allocation7], 128  }
   0x8   :  { %226 = vsyncadd [#allocation7], 4294967168 }
   0x9   :  { %227 = dma.done.wait [#allocation9], 128  }
   0xa   :  { %228 = vsyncadd [#allocation9], 4294967168  ;;  %v64_v0 = vld [vmem:[#allocation8] sm:$0xff]  ;;  %v43_v2 = vld [vmem:[#allocation6] sm:$0xff]  ;;  %vm61_vm6 = vcmask 7168   ;;  %v231_v25 = vmov -inf   ;;  %v105_v37 = vlaneseq }
   0xb   :  { %v65_v1 = vmul.f32 %v64_v0, %v64_v0  ;;  %v44_v3 = vmul.f32 %v43_v2, %v43_v2  ;;  %62 = vst.msk [vmem:[#allocation3] sm:$0xff] %vm61_vm6, %v231_v25  ;;  %vm111_vm7 = vcmask 64512   ;;  %v232_v28 = vmov 0  }
   0xc   :  { %165 = vset.pattern.permute.xlu1 %v232_v28  ;;  %166 = vset.pattern.permute.xlu0 %v232_v28  ;;  %v233_v29 = vmov 0.0   ;;  %v106_v38 = vshrl.u32 %v105_v37, 7  ;;  %v108_v39 = vand.u32 127, %v105_v37 }
   0xd   :  { %66 = vadd.xlane.f32.xlu0 %v65_v1  ;;  %63 = vst.msk [vmem:[#allocation4] sm:$0xff] %vm61_vm6, %v233_v29 }
   0xe   :  { %vm109_vm8 = vcmp.eq.s32.totalorder %v106_v38, %v108_v39 }
  0x12   :  { %v117_v30 = vld [vmem:[#allocation3] sm:$0xff] }
  0x14   :  { %v126_v46 = vld [vmem:[#allocation4] sm:$0xff] }
  0x15   :  { %45 = vadd.xlane.f32.xlu0 %v44_v3 }
  0x80   :  { %v67_v4 = vpop.xlane.xlu0 %66 }
  0x81   :  { %v68_v5 = vmax.f32 %v67_v4, 1e-16 }
  0x83   :  { %167 = vrsqrt.f32 %v68_v5  ;;  %vm75_vm1 = vweird.f32 %v68_v5 }
  0x88   :  { %v46_v6 = vpop.xlane.xlu0 %45 }
  0x89   :  { %v168_v7 = vpop.eup %167  ;;  %v47_v8 = vmax.f32 %v46_v6, 1e-16 }
  0x8a   :  { %v70_v9 = vmul.f32 %v168_v7, %v68_v5  ;;  %vm76_vm0 = vweird.f32 %v168_v7 }
  0x8b   :  { %169 = vrsqrt.f32 %v47_v8  ;;  %vm77_vm2 = vmor %vm75_vm1, %vm76_vm0  ;;  %vm54_vm4 = vweird.f32 %v47_v8 }
  0x8c   :  { %v71_v10 = vmul.f32 %v168_v7, %v70_v9 }
  0x8e   :  { %v72_v11 = vmul.f32 0.5, %v71_v10 }
  0x90   :  { %v73_v12 = vsub.f32 1.5, %v72_v11 }
  0x91   :  { %v170_v13 = vpop.eup %169 }
  0x92   :  { %v49_v14 = vmul.f32 %v170_v13, %v47_v8  ;;  %v74_v15 = vmul.f32 %v168_v7, %v73_v12  ;;  %vm55_vm3 = vweird.f32 %v170_v13 }
  0x93   :  { %vm56_vm5 = vmor %vm54_vm4, %vm55_vm3 }
  0x94   :  { %v50_v16 = vmul.f32 %v170_v13, %v49_v14  ;;  %v78_v17 = vsel %vm77_vm2, %v168_v7, %v74_v15 }
  0x95   :  { %v79_v18 = vmul.f32 %v78_v17, %v64_v0 }
  0x96   :  { %v51_v19 = vmul.f32 0.5, %v50_v16 }
  0x97   :  { %96 = vmatpush.xpose.msra.mxu0 %v79_v18 }
  0x98   :  { %v52_v20 = vsub.f32 1.5, %v51_v19 }
  0x9a   :  { %v53_v21 = vmul.f32 %v170_v13, %v52_v20 }
  0x9c   :  { %v57_v22 = vsel %vm56_vm5, %v170_v13, %v53_v21 }
  0x9d   :  { %v58_v23 = vmul.f32 2.0, %v57_v22 }
  0x9f   :  { %v59_v24 = vmul.f32 %v58_v23, %v43_v2 }
  0xa1   :  { %97 = vmatmul.f32.vlgmr.msra.gmra.mxu0 %v59_v24 }
 0x11e   :  { %v98_v26 = vpop.f32.mrf.mxu0 }
 0x11f   :  { %v119_v27 = vsel %vm111_vm7, %v98_v26, -inf  ;;  %v110_v42 = vsel %vm109_vm8, %v98_v26, 0.0 }
 0x120   :  { %120 = vmax.xlane.f32.xlu1 %v119_v27  ;;  %v112_v43 = vsel %vm111_vm7, %v110_v42, 0.0 }
 0x193   :  { %v121_v31 = vpop.xlane.xlu1 %120 }
 0x194   :  { %v122_v32 = vmax.f32 %v117_v30, %v121_v31 }
 0x196   :  { %v123_v33 = vsub.f32 %v117_v30, %v122_v32  ;;  %142 = vst.msk [vmem:[#allocation3] sm:$0xff] %vm61_vm6, %v122_v32  ;;  %130 = vperm.xlu1 %165, %v122_v32  }
 0x198   :  { %v124_v44 = vmul.f32 1.442695, %v123_v33 }
 0x19d   :  { %v149_v54 = vld [vmem:[#allocation3] sm:$0xff] }
 0x208   :  { %v131_v34 = vpop.permute.xlu1 %130 }
 0x209   :  { %v133_v35 = vsub.f32 %v98_v26, %v131_v34 }
 0x20b   :  { %v134_v36 = vmul.f32 1.442695, %v133_v35 }
 0x20d   :  { %171 = vpow2.f32 %v134_v36 }
 0x20e   :  { %173 = vpow2.f32 %v124_v44 }
 0x213   :  { %v172_v40 = vpop.eup %171 }
 0x214   :  { %v136_v41 = vsel %vm111_vm7, %v172_v40, 0.0  ;;  %v174_v45 = vpop.eup %173 }
 0x215   :  { %137 = vadd.xlane.f32.xlu2 %v136_v41  ;;  %v127_v47 = vmul.f32 %v174_v45, %v126_v46 }
 0x21d   :  { %113 = vadd.xlane.f32.xlu2 %v112_v43 }
 0x288   :  { %v138_v48 = vpop.xlane.xlu2 %137 }
 0x289   :  { %v139_v49 = vadd.f32 %v138_v48, %v127_v47 }
 0x28b   :  { %141 = vst.msk [vmem:[#allocation4] sm:$0xff] %vm61_vm6, %v139_v49 }
 0x290   :  { %v114_v50 = vpop.xlane.xlu2 %113 }
 0x291   :  { %116 = vst.msk [vmem:[#allocation5] sm:$0xff] %vm61_vm6, %v114_v50 }
 0x292   :  { %v146_v51 = vld [vmem:[#allocation4] sm:$0xff] }
 0x293   :  { %175 = vlog2.f32 %v146_v51 }
 0x298   :  { %v151_v56 = vld [vmem:[#allocation5] sm:$0xff] }
 0x299   :  { %v176_v52 = vpop.eup %175 }
 0x29a   :  { %v148_v53 = vmul.f32 0.6931472, %v176_v52 }
 0x29c   :  { %v150_v55 = vadd.f32 %v149_v54, %v148_v53 }
 0x29e   :  { %v152_v57 = vsub.f32 %v150_v55, %v151_v56 }
 0x2a0   :  { %153 = vst.msk [vmem:[%s269_s2] sm:$0xff] %vm61_vm6, %v152_v57 }
 0x2a1   :  { %158 = vsyncpa [#allocation7], 1 }
 0x2a2   :  { %159 = vsyncpa [#allocation9], 1 }

</bundles_post_ra>
